<compile_context>
chip_gen: v6e
topology: v6e:2x2x1
jax: 0.10.0
libtpu: 0.0.40
codegen_flags: <defaults>
</compile_context>

<pallas_src>
import functools

import jax
import jax.numpy as jnp
from jax import lax
from jax.experimental import pallas as pl
from jax.experimental.pallas import tpu as pltpu

F_IN = 2048      # fc1 input features
H = 100          # fc1 output features (hidden)
H_PAD = 128      # padded hidden dim (lane multiple)
EPS = 1e-5       # BatchNorm1d default eps
TILE_B = 512     # batch tile for the pipelined path (multiple of 256)


# --------------------------------------------------------------------------
# VMEM budgeting (review: v7x physical VMEM is 64 MiB/TC, never request 96 MiB)
# --------------------------------------------------------------------------
def _vmem_hard_cap():
    """3/4 of physical VMEM (v7x: 64 MiB -> 48 MiB cap), never below 16 MiB."""
    cap = 64 << 20  # conservative default: v7x per-TensorCore VMEM
    get_info = getattr(pltpu, "get_tpu_info", None)
    if get_info is not None:
        try:
            cap = int(getattr(get_info(), "vmem_capacity_bytes", cap))
        except Exception:
            pass
    return max(16 << 20, (cap * 3) // 4)


def _vmem_limit(need_bytes):
    return int(min(max(int(need_bytes) + (4 << 20), 16 << 20), _vmem_hard_cap()))


# --------------------------------------------------------------------------
# Kernels
# --------------------------------------------------------------------------
def _mlp_small_kernel(x_ref, w1_ref, b1_ref, gamma_ref, beta_ref, w2_ref,
                      b2_ref, fc1z_ref, fc2z_ref, *, apply_bn):
    """Single-shot path (B <= TILE_B). One-pass BN, fc2 via VPU + lane reduce."""
    x = x_ref[...]
    if x.dtype != w1_ref.dtype:
        x = x.astype(w1_ref.dtype)          # only needed on the f32-x/bf16-w1 path
    z1 = jnp.dot(x, w1_ref[...], preferred_element_type=jnp.float32) + b1_ref[...]

    # fc1_z stored directly at width 100 (masked store) -- no post-kernel slice.
    fc1z_ref[...] = z1[:, :H]

    y = jnp.maximum(z1, 0.0)                # padded lanes stay 0
    if apply_bn:
        mean = jnp.mean(y, axis=0, keepdims=True)
        diff = y - mean
        var = jnp.mean(diff * diff, axis=0, keepdims=True)
        y = diff * lax.rsqrt(var + EPS) * gamma_ref[...] + beta_ref[...]

    # fc2 (100 -> 1): VPU multiply + lane reduction (padded w2 lanes are zero).
    fc2z_ref[...] = jnp.sum(y * w2_ref[...], axis=-1, keepdims=True) + b2_ref[...]


def _fc1_stats_kernel(x_ref, w1_ref, b1_ref, fc1z_ref, stats_ref, *,
                      batch, tile_b, mask_tail):
    """Tiled pass 1: fc1 matmul, write fc1_z, emit per-tile sum / sum-of-sq."""
    x = x_ref[...]
    if x.dtype != w1_ref.dtype:
        x = x.astype(w1_ref.dtype)
    z1 = jnp.dot(x, w1_ref[...], preferred_element_type=jnp.float32) + b1_ref[...]
    fc1z_ref[...] = z1[:, :H]

    y = jnp.maximum(z1, 0.0)
    if mask_tail:
        # Mask rows beyond the true batch (garbage in the partial last tile)
        # out of the BatchNorm statistics.  jnp.where is a select, so any
        # NaN/Inf garbage is cleanly dropped.
        row = (pl.program_id(0) * tile_b
               + lax.broadcasted_iota(jnp.int32, (tile_b, 1), 0))
        y = jnp.where(row < batch, y, 0.0)

    ssum = jnp.sum(y, axis=0, keepdims=True)        # (1, H_PAD)
    ssq = jnp.sum(y * y, axis=0, keepdims=True)     # (1, H_PAD)
    stats_ref[0] = jnp.concatenate([ssum, ssq], axis=0)


def _fc2_folded_kernel(fc1z_ref, w2eff_ref, c_ref, out_ref):
    """Tiled pass 2: relu + BN-folded fc2, lane-dense (1, TILE_B) output.

    w2eff is padded to 8 sublanes (row 0 = effective weights, rest zero) so
    this is a plain (8, H) x (TILE_B, H)^T MXU matmul; row 0 of the result is
    the lane-dense fc2_z for the tile.
    """
    y = jnp.maximum(fc1z_ref[...], 0.0)                       # (TILE_B, H)
    acc = lax.dot_general(w2eff_ref[...], y,
                          dimension_numbers=(((1,), (1,)), ((), ())),
                          preferred_element_type=jnp.float32)  # (8, TILE_B)
    out_ref[0] = acc[0:1, :] + c_ref[...]                      # (1, TILE_B)


# --------------------------------------------------------------------------
# Parameter prep (one-time) and forward wrapper
# --------------------------------------------------------------------------
def prepare_params(w1, b1, gamma, beta, w2, b2, *, matmul_dtype=jnp.bfloat16):
    """One-time parameter prep (transpose / pad / cast).  Call once, reuse."""
    w1_t = jnp.zeros((F_IN, H_PAD), matmul_dtype).at[:, :H].set(
        w1.T.astype(matmul_dtype))                                      # (2048, 128)
    b1_p = jnp.zeros((1, H_PAD), jnp.float32).at[:, :H].set(b1)
    g_p = jnp.zeros((1, H_PAD), jnp.float32).at[:, :H].set(gamma)
    be_p = jnp.zeros((1, H_PAD), jnp.float32).at[:, :H].set(beta)
    w2_p = jnp.zeros((1, H_PAD), jnp.float32).at[:, :H].set(w2.reshape(-1))
    b2_p = b2.reshape(1, 1).astype(jnp.float32)
    return (w1_t, b1_p, g_p, be_p, w2_p, b2_p)


@jax.jit
def mlp_forward(x, params):
    """x: (B, 2048) f32 or bf16, params from prepare_params().
    Returns (fc2_z: (B, 1) f32, fc1_z: (B, 100) f32)."""
    w1_t, b1_p, g_p, be_p, w2_p, b2_p = params
    B = x.shape[0]
    x_bytes = x.dtype.itemsize
    w1_bytes = w1_t.dtype.itemsize

    # ---------------- small-batch single-shot path ----------------
    if B <= TILE_B:
        apply_bn = B > 1  # PyTorch skips BN when batch == 1 (static branch)
        need = (B * F_IN * x_bytes + F_IN * H_PAD * w1_bytes
                + 5 * H_PAD * 4 + 4 + B * H * 4 + B * 4)

        def full(shape):
            return pl.BlockSpec(shape, lambda: (0,) * len(shape))

        fc1z, fc2z = pl.pallas_call(
            functools.partial(_mlp_small_kernel, apply_bn=apply_bn),
            out_shape=(
                jax.ShapeDtypeStruct((B, H), jnp.float32),
                jax.ShapeDtypeStruct((B, 1), jnp.float32),
            ),
            grid=(),
            in_specs=[
                full((B, F_IN)),
                full((F_IN, H_PAD)),
                full((1, H_PAD)),
                full((1, H_PAD)),
                full((1, H_PAD)),
                full((1, H_PAD)),
                full((1, 1)),
            ],
            out_specs=(full((B, H)), full((B, 1))),
            compiler_params=pltpu.CompilerParams(
                vmem_limit_bytes=_vmem_limit(2 * need)),
        )(x, w1_t, b1_p, g_p, be_p, w2_p, b2_p)
        return fc2z, fc1z

    # ---------------- tiled, pipelined two-pass path (B > TILE_B) ----------
    n_tiles = pl.cdiv(B, TILE_B)
    mask_tail = (B % TILE_B) != 0

    # Pass 1: fc1 + per-tile BN partial statistics.
    need1 = (2 * TILE_B * F_IN * x_bytes          # x tile, double-buffered
             + 2 * F_IN * H_PAD * w1_bytes        # w1 (VMEM-resident)
             + 2 * (TILE_B * H * 4 + 2 * H_PAD * 4)   # outputs, double-buffered
             + 2 * H_PAD * 4)                     # b1
    fc1z, stats = pl.pallas_call(
        functools.partial(_fc1_stats_kernel, batch=B, tile_b=TILE_B,
                          mask_tail=mask_tail),
        out_shape=(
            jax.ShapeDtypeStruct((B, H), jnp.float32),
            jax.ShapeDtypeStruct((n_tiles, 2, H_PAD), jnp.float32),
        ),
        grid=(n_tiles,),
        in_specs=[
            pl.BlockSpec((TILE_B, F_IN), lambda t: (t, 0)),
            pl.BlockSpec((F_IN, H_PAD), lambda t: (0, 0)),   # resident weights
            pl.BlockSpec((1, H_PAD), lambda t: (0, 0)),
        ],
        out_specs=(
            pl.BlockSpec((TILE_B, H), lambda t: (t, 0)),
            pl.BlockSpec((1, 2, H_PAD), lambda t: (t, 0, 0)),
        ),
        compiler_params=pltpu.CompilerParams(
            dimension_semantics=("parallel",),           # v7x: shard across TCs
            vmem_limit_bytes=_vmem_limit(need1)),
    )(x, w1_t, b1_p)

    # Fold training-mode BatchNorm (biased batch variance) into fc2:
    #   fc2_z[b] = sum_j w2_eff[j] * relu(z1)[b, j] + c
    s = jnp.sum(stats, axis=0)                        # (2, H_PAD)
    mean = s[0:1] / B                                 # (1, H_PAD)
    var = jnp.maximum(s[1:2] / B - mean * mean, 0.0)
    inv = g_p * lax.rsqrt(var + EPS)                  # padded lanes: gamma=0 -> 0
    w2_eff = (w2_p * inv)[:, :H]                      # (1, H)
    c = b2_p + jnp.sum(w2_p * (be_p - inv * mean), axis=-1, keepdims=True)  # (1,1)
    # Pad effective weights to 8 sublanes (row 0 live) for a clean MXU matmul.
    w2_eff8 = jnp.zeros((8, H), jnp.float32).at[0:1].set(w2_eff)

    # Pass 2: re-read fc1_z, relu + folded dot, lane-dense fc2 output.
    need2 = 2 * TILE_B * H * 4 + 8 * H * 4 + 4 + 2 * TILE_B * 4
    fc2_tiles = pl.pallas_call(
        _fc2_folded_kernel,
        out_shape=jax.ShapeDtypeStruct((n_tiles, 1, TILE_B), jnp.float32),
        grid=(n_tiles,),
        in_specs=[
            pl.BlockSpec((TILE_B, H), lambda t: (t, 0)),
            pl.BlockSpec((8, H), lambda t: (0, 0)),
            pl.BlockSpec((1, 1), lambda t: (0, 0)),
        ],
        out_specs=pl.BlockSpec((1, 1, TILE_B), lambda t: (t, 0, 0)),
        compiler_params=pltpu.CompilerParams(
            dimension_semantics=("parallel",),
            vmem_limit_bytes=_vmem_limit(need2)),
    )(fc1z, w2_eff8, c)

    # Lane-dense (n_tiles, 1, TILE_B) -> (B, 1); padded tail lanes sliced off.
    fc2z = fc2_tiles.reshape(n_tiles * TILE_B, 1)[:B]
    return fc2z, fc1z


# --------------------------------------------------------------------------
# Pure-JAX reference & tests
# --------------------------------------------------------------------------
def _reference(x, w1, b1, gamma, beta, w2, b2, matmul_dtype=jnp.float32):
    z1 = jnp.dot(x.astype(matmul_dtype), w1.T.astype(matmul_dtype),
                 preferred_element_type=jnp.float32) + b1
    y = jnp.maximum(z1, 0.0)
    if x.shape[0] > 1:
        mean = jnp.mean(y, axis=0, keepdims=True)
        var = jnp.mean((y - mean) ** 2, axis=0, keepdims=True)
        y = (y - mean) / jnp.sqrt(var + EPS) * gamma + beta
    z2 = y @ w2.T + b2
    return z2, z1


if __name__ == "__main__":
    key = jax.random.PRNGKey(0)
    k_x, k_w1, k_b1, k_w2, k_b2 = jax.random.split(key, 5)

    # Parameters mirroring the module's __init__:
    #   fc1.weight ~ N(0,1) (100,2048); fc1.bias ~ U(-1/sqrt(2048), 1/sqrt(2048))
    #   fc2.weight ~ N(0,1) (1,100);    fc2.bias ~ U(-1/sqrt(100), 1/sqrt(100))
    #   BatchNorm1d affine: gamma=1, beta=0
    w1 = jax.random.normal(k_w1, (H, F_IN), jnp.float32)
    b1 = jax.random.uniform(k_b1, (H,), jnp.float32,
                            -1.0 / jnp.sqrt(F_IN), 1.0 / jnp.sqrt(F_IN))
    w2 = jax.random.normal(k_w2, (1, H), jnp.float32)
    b2 = jax.random.uniform(k_b2, (1,), jnp.float32,
                            -1.0 / jnp.sqrt(H), 1.0 / jnp.sqrt(H))
    gamma = jnp.ones((H,), jnp.float32)
    beta = jnp.zeros((H,), jnp.float32)

    params_f32 = prepare_params(w1, b1, gamma, beta, w2, b2,
                                matmul_dtype=jnp.float32)
    params_bf16 = prepare_params(w1, b1, gamma, beta, w2, b2,
                                 matmul_dtype=jnp.bfloat16)

    # ---- small batch, exact-precision path (single-shot kernel, BN applied).
    B = 8
    x = jax.random.normal(k_x, (B, F_IN), jnp.float32)
    fc2_z, fc1_z = mlp_forward(x, params_f32)
    jax.block_until_ready((fc2_z, fc1_z))
    ref2, ref1 = _reference(x, w1, b1, gamma, beta, w2, b2, jnp.float32)
    assert fc2_z.shape == (B, 1) and fc1_z.shape == (B, H)
    assert jnp.allclose(fc1_z, ref1, atol=1e-3, rtol=1e-3)
    assert jnp.allclose(fc2_z, ref2, atol=1e-3, rtol=1e-3)

    # ---- small batch, fast path (bf16 fc1 operands, f32 accumulation).
    fc2_zb, fc1_zb = mlp_forward(x, params_bf16)
    jax.block_until_ready((fc2_zb, fc1_zb))
    refb2, refb1 = _reference(x, w1, b1, gamma, beta, w2, b2, jnp.bfloat16)
    assert jnp.allclose(fc1_zb, refb1, atol=5e-2, rtol=5e-3)
    assert jnp.allclose(fc2_zb, refb2, atol=5e-2, rtol=5e-3)

    # ---- B == 1: PyTorch skips BatchNorm when batch == 1.
    x1 = x[:1]
    fc2_z1, fc1_z1 = mlp_forward(x1, params_f32)
    jax.block_until_ready((fc2_z1, fc1_z1))
    r2, r1 = _reference(x1, w1, b1, gamma, beta, w2, b2, jnp.float32)
    assert fc2_z1.shape == (1, 1) and fc1_z1.shape == (1, H)
    assert jnp.allclose(fc1_z1, r1, atol=1e-3, rtol=1e-3)
    assert jnp.allclose(fc2_z1, r2, atol=1e-3, rtol=1e-3)

    # ---- tiled two-pass path: B = 1040 -> 3 batch tiles, partial last tile.
    BT = 1040
    xt = jax.random.normal(jax.random.PRNGKey(1), (BT, F_IN), jnp.float32)
    fc2_t, fc1_t = mlp_forward(xt, params_f32)
    jax.block_until_ready((fc2_t, fc1_t))
    rt2, rt1 = _reference(xt, w1, b1, gamma, beta, w2, b2, jnp.float32)
    assert fc2_t.shape == (BT, 1) and fc1_t.shape == (BT, H)
    assert jnp.allclose(fc1_t, rt1, atol=2e-3, rtol=1e-3)
    assert jnp.allclose(fc2_t, rt2, atol=1e-2, rtol=2e-3)

    # ---- tiled fast path: bf16 weights AND bf16 x (halves the dominant DMA).
    xt_bf16 = xt.astype(jnp.bfloat16)
    fc2_tb, fc1_tb = mlp_forward(xt_bf16, params_bf16)
    jax.block_until_ready((fc2_tb, fc1_tb))
    rtb2, rtb1 = _reference(xt_bf16, w1, b1, gamma, beta, w2, b2, jnp.bfloat16)
    assert jnp.allclose(fc1_tb, rtb1, atol=5e-2, rtol=5e-3)
    assert jnp.allclose(fc2_tb, rtb2, atol=1e-1, rtol=1e-2)

    print("KERNEL_OK")
</pallas_src>

<mosaic_0001>
module attributes {stable_mosaic.version = 11 : i64} {
  func.func @_mlp_small_kernel(%arg0: memref<8x2048xf32, #tpu.memory_space<vmem>>, %arg1: memref<2048x128xf32, #tpu.memory_space<vmem>>, %arg2: memref<1x128xf32, #tpu.memory_space<vmem>>, %arg3: memref<1x128xf32, #tpu.memory_space<vmem>>, %arg4: memref<1x128xf32, #tpu.memory_space<vmem>>, %arg5: memref<1x128xf32, #tpu.memory_space<vmem>>, %arg6: memref<1x1xf32, #tpu.memory_space<vmem>>, %arg7: memref<8x100xf32, #tpu.memory_space<vmem>>, %arg8: memref<8x1xf32, #tpu.memory_space<vmem>>) attributes {dimension_semantics = [], scalar_prefetch = 0 : i64, scratch_operands = 0 : i64, tpu.core_type = #tpu.core_type<tc>} {
    %c0 = arith.constant 0 : index
    %c0_0 = arith.constant 0 : index
    %0 = vector.load %arg0[%c0, %c0_0] : memref<8x2048xf32, #tpu.memory_space<vmem>>, vector<8x2048xf32>
    %c0_1 = arith.constant 0 : index
    %c0_2 = arith.constant 0 : index
    %1 = vector.load %arg1[%c0_1, %c0_2] : memref<2048x128xf32, #tpu.memory_space<vmem>>, vector<2048x128xf32>
    %cst = arith.constant dense<0.000000e+00> : vector<8x128xf32>
    %2 = tpu.matmul %0, %1, %cst {dimension_numbers = #tpu.dot_dimension_numbers<[1], [0], [0], [1], [0, 0, 1, 1], [], []>} : vector<8x2048xf32>, vector<2048x128xf32>, vector<8x128xf32> -> vector<8x128xf32>
    %c0_3 = arith.constant 0 : index
    %c0_4 = arith.constant 0 : index
    %3 = vector.load %arg2[%c0_3, %c0_4] : memref<1x128xf32, #tpu.memory_space<vmem>>, vector<1x128xf32>
    %4 = vector.broadcast %3 : vector<1x128xf32> to vector<8x128xf32>
    %5 = arith.addf %2, %4 : vector<8x128xf32>
    %6 = vector.extract_strided_slice %5 {offsets = [0, 0], sizes = [8, 100], strides = [1, 1]} : vector<8x128xf32> to vector<8x100xf32>
    %c0_5 = arith.constant 0 : index
    %c0_6 = arith.constant 0 : index
    %7 = vector.load %arg7[%c0_5, %c0_6] : memref<8x100xf32, #tpu.memory_space<vmem>>, vector<8x100xf32>
    tpu.vector_store %arg7[%c0_5, %c0_6], %6 {strides = array<i32>} : memref<8x100xf32, #tpu.memory_space<vmem>>, vector<8x100xf32>,
    %cst_7 = arith.constant 0.000000e+00 : f32
    %8 = vector.broadcast %cst_7 : f32 to vector<8x128xf32>
    %9 = arith.maximumf %5, %8 : vector<8x128xf32>
    %cst_8 = arith.constant dense<0.000000e+00> : vector<128xf32>
    %10 = vector.multi_reduction <add>, %9, %cst_8 [0] : vector<8x128xf32> to vector<128xf32>
    %11 = vector.shape_cast %10 : vector<128xf32> to vector<1x128xf32>
    %cst_9 = arith.constant 8.000000e+00 : f32
    %12 = vector.broadcast %cst_9 : f32 to vector<1x128xf32>
    %13 = arith.divf %11, %12 : vector<1x128xf32>
    %14 = vector.broadcast %13 : vector<1x128xf32> to vector<8x128xf32>
    %15 = arith.subf %9, %14 : vector<8x128xf32>
    %16 = arith.mulf %15, %15 : vector<8x128xf32>
    %cst_10 = arith.constant dense<0.000000e+00> : vector<128xf32>
    %17 = vector.multi_reduction <add>, %16, %cst_10 [0] : vector<8x128xf32> to vector<128xf32>
    %18 = vector.shape_cast %17 : vector<128xf32> to vector<1x128xf32>
    %cst_11 = arith.constant 8.000000e+00 : f32
    %19 = vector.broadcast %cst_11 : f32 to vector<1x128xf32>
    %20 = arith.divf %18, %19 : vector<1x128xf32>
    %cst_12 = arith.constant 9.99999974E-6 : f32
    %21 = vector.broadcast %cst_12 : f32 to vector<1x128xf32>
    %22 = arith.addf %20, %21 : vector<1x128xf32>
    %23 = math.rsqrt %22 : vector<1x128xf32>
    %24 = vector.broadcast %23 : vector<1x128xf32> to vector<8x128xf32>
    %25 = arith.mulf %15, %24 : vector<8x128xf32>
    %c0_13 = arith.constant 0 : index
    %c0_14 = arith.constant 0 : index
    %26 = vector.load %arg3[%c0_13, %c0_14] : memref<1x128xf32, #tpu.memory_space<vmem>>, vector<1x128xf32>
    %27 = vector.broadcast %26 : vector<1x128xf32> to vector<8x128xf32>
    %28 = arith.mulf %25, %27 : vector<8x128xf32>
    %c0_15 = arith.constant 0 : index
    %c0_16 = arith.constant 0 : index
    %29 = vector.load %arg4[%c0_15, %c0_16] : memref<1x128xf32, #tpu.memory_space<vmem>>, vector<1x128xf32>
    %30 = vector.broadcast %29 : vector<1x128xf32> to vector<8x128xf32>
    %31 = arith.addf %28, %30 : vector<8x128xf32>
    %c0_17 = arith.constant 0 : index
    %c0_18 = arith.constant 0 : index
    %32 = vector.load %arg5[%c0_17, %c0_18] : memref<1x128xf32, #tpu.memory_space<vmem>>, vector<1x128xf32>
    %33 = vector.broadcast %32 : vector<1x128xf32> to vector<8x128xf32>
    %34 = arith.mulf %31, %33 : vector<8x128xf32>
    %cst_19 = arith.constant dense<0.000000e+00> : vector<8xf32>
    %35 = vector.multi_reduction <add>, %34, %cst_19 [1] : vector<8x128xf32> to vector<8xf32>
    %36 = vector.shape_cast %35 : vector<8xf32> to vector<8x1xf32>
    %c0_20 = arith.constant 0 : index
    %c0_21 = arith.constant 0 : index
    %37 = vector.load %arg6[%c0_20, %c0_21] : memref<1x1xf32, #tpu.memory_space<vmem>>, vector<1x1xf32>
    %38 = vector.broadcast %37 : vector<1x1xf32> to vector<8x1xf32>
    %39 = arith.addf %36, %38 : vector<8x1xf32>
    %c0_22 = arith.constant 0 : index
    %c0_23 = arith.constant 0 : index
    %40 = vector.load %arg8[%c0_22, %c0_23] : memref<8x1xf32, #tpu.memory_space<vmem>>, vector<8x1xf32>
    tpu.vector_store %arg8[%c0_22, %c0_23], %39 {strides = array<i32>} : memref<8x1xf32, #tpu.memory_space<vmem>>, vector<8x1xf32>,
    return
  }
}

</mosaic_0001>

<bundles_post_ra>
// kernel: mlp_forward.1
= control target key start
LH: loop header
LB: loop body
LE: loop exit
PB: predicated region body
PF: predicated region fallthrough
CT: control target
= control target key end

     0   :  { %s1410_s0 = inlined_call_operand.hbm [shape: f32[8,2048], index: 0, kind: input, shape index: {}]   ;;  %s1411_s1 = inlined_call_operand.hbm [shape: f32[2048,128], index: 1, kind: input, shape index: {}]   ;;  %s1412_s2 = inlined_call_operand.vmem [shape: f32[1,128], index: 2, kind: input, shape index: {}]   ;;  %s1413_s3 = inlined_call_operand.vmem [shape: f32[1,128], index: 3, kind: input, shape index: {}]   ;;  %s1414_s4 = inlined_call_operand.vmem [shape: f32[1,128], index: 4, kind: input, shape index: {}]   ;;  %s1415_s5 = inlined_call_operand.vmem [shape: f32[1,128], index: 5, kind: input, shape index: {}]   ;;  %s1416_s6 = inlined_call_operand.<no memory space> [shape: f32[1,1], index: 6, kind: input, shape index: {}]   ;;  %s1417_s7 = inlined_call_operand.hbm [shape: f32[8,100], index: 7, kind: output, shape index: {0}]   ;;  %s1418_s8 = inlined_call_operand.vmem [shape: f32[8,1], index: 8, kind: output, shape index: {1}]  }
   0x1   :  { %v14_v0 = vstv %s1416_s6 }
   0x2   :  { %15 = vst [vmem:[#allocation2] sm:$0x1] %v14_v0 }
   0x3   :  { %16 = vsyncpa [#allocation4], 0 }
   0x4   :  { %17 = vsyncpa [#allocation7], 0 }
   0x5   :  { %18 = vsyncpa [#allocation5], 0  ;;  %s1333_s29 = smov [#allocation3]   ;;  %s1334_s9 = smov [#allocation6]  }
   0x6   :  { %s25_s30 = sshll.u32 %s1333_s29, 4  ;;  %s34_s10 = sshll.u32 %s1334_s9, 4  ;;  %s26_s30 = int_to_ptr.vmem [resolvable:$true] %s25_s30  ;;  %s35_s10 = int_to_ptr.vmem [resolvable:$true] %s34_s10 }
   0x7   :  { %s1275_s11 = scalar_lea.vmem %s26_s30, 2048  ;;  %p1280_p1 = scmp.lt.s32.totalorder %s26_s30, %s26_s30 }
   0x8   :  { %p1276_p0 = scmp.ne.s32.totalorder %s26_s30, %s1275_s11  ;;  %p1281_p2 = scmp.lt.s32.totalorder %s1275_s11, %s1275_s11 }
   0xa   :  { %p1282_p3 = por %p1281_p2, %p1280_p1 }
   0xc   :  { %p1283_p4 = pnand %p1282_p3, %p1276_p0 }
   0xe   :  { %1286 = shalt.err (!%p1283_p4)
}
   0xf   :  { %28 = dma.hbm_to_vmem [thread:$0]  %s1410_s0, 2048, %s26_s30, [#allocation4]  }
  0x10   :  { %s1295_s6 = scalar_lea.vmem %s35_s10, 32768  ;;  %p1300_p6 = scmp.lt.s32.totalorder %s35_s10, %s35_s10 }
  0x11   :  { %p1296_p5 = scmp.ne.s32.totalorder %s35_s10, %s1295_s6  ;;  %p1301_p7 = scmp.lt.s32.totalorder %s1295_s6, %s1295_s6 }
  0x13   :  { %p1302_p8 = por %p1301_p7, %p1300_p6 }
  0x15   :  { %p1303_p9 = pnand %p1302_p8, %p1296_p5 }
  0x17   :  { %1306 = shalt.err (!%p1303_p9)
}
  0x18   :  { %s1335_s14 = smov 128   ;;  %s1336_s15 = smov 8  }
  0x19   :  { %40 = dma.hbm_to_vmem [thread:$0]  %s1411_s1, 32768, %s35_s10, [#allocation7], %s1335_s14, %s1335_s14, %s1336_s15  }
  0x1a   :  { %1327 = dma.done.wait [#allocation4], 2048  }
  0x1b   :  { %1328 = vsyncadd [#allocation4], 4294965248 }
  0x1c   :  { %1329 = dma.done.wait [#allocation7], 32768  }
  0x1d   :  { %1330 = vsyncadd [#allocation7], 4294934528  ;;  %v104_v1 = vld [vmem:[#allocation6 + $0xf8] sm:$0xff]  ;;  %v103_v5 = vld [vmem:[#allocation6 + $0xf0] sm:$0xff]  ;;  %vm896_vm0 = vcmask 818176   ;;  %s1337_s23 = smov [#allocation8]  }
  0x1e   :  { %v136_v2 = vld [vmem:[#allocation6 + $0x1f8] sm:$0xff]  ;;  %980 = vmatprep.subr.mxu0 %v104_v1  ;;  %v135_v6 = vld [vmem:[#allocation6 + $0x1f0] sm:$0xff]  ;;  %v102_v9 = vld [vmem:[#allocation6 + $0xe8] sm:$0xff]  ;;  %s961_s24 = sshll.u32 %s1337_s23, 4  ;;  %s962_s24 = int_to_ptr.vmem [resolvable:$true] %s961_s24 }
  0x1f   :  { %v88_v3 = vld [vmem:[#allocation6 + $0x78] sm:$0xff]  ;;  %1015 = vmatprep.subr.mxu1 %v136_v2  ;;  %v87_v7 = vld [vmem:[#allocation6 + $0x70] sm:$0xff]  ;;  %v134_v10 = vld [vmem:[#allocation6 + $0x1e8] sm:$0xff]  ;;  %s1307_s25 = scalar_lea.vmem %s962_s24, 128  ;;  %p1312_p11 = scmp.lt.s32.totalorder %s962_s24, %s962_s24 }
  0x20   :  { %v120_v4 = vld [vmem:[#allocation6 + $0x178] sm:$0xff]  ;;  %981 = vmatpush3.msra.mxu0 %v88_v3  ;;  %v119_v8 = vld [vmem:[#allocation6 + $0x170] sm:$0xff]  ;;  %v86_v11 = vld [vmem:[#allocation6 + $0x68] sm:$0xff]  ;;  %p1308_p10 = scmp.ne.s32.totalorder %s962_s24, %s1307_s25  ;;  %p1313_p12 = scmp.lt.s32.totalorder %s1307_s25, %s1307_s25 }
  0x21   :  { %1016 = vmatpush3.msra.mxu1 %v120_v4  ;;  %982 = vmatprep.subr.mxu0 %v103_v5  ;;  %v118_v12 = vld [vmem:[#allocation6 + $0x168] sm:$0xff]  ;;  %v101_v13 = vld [vmem:[#allocation6 + $0xe0] sm:$0xff]  ;;  %v100_v17 = vld [vmem:[#allocation6 + $0xd8] sm:$0xff] }
  0x22   :  { %1017 = vmatprep.subr.mxu1 %v135_v6  ;;  %983 = vmatpush3.msra.mxu0 %v87_v7  ;;  %v133_v14 = vld [vmem:[#allocation6 + $0x1e0] sm:$0xff]  ;;  %v132_v18 = vld [vmem:[#allocation6 + $0x1d8] sm:$0xff]  ;;  %v99_v21 = vld [vmem:[#allocation6 + $0xd0] sm:$0xff]  ;;  %p1314_p13 = por %p1313_p12, %p1312_p11 }
  0x23   :  { %1018 = vmatpush3.msra.mxu1 %v119_v8  ;;  %984 = vmatprep.subr.mxu0 %v102_v9  ;;  %v85_v15 = vld [vmem:[#allocation6 + $0x60] sm:$0xff]  ;;  %v84_v19 = vld [vmem:[#allocation6 + $0x58] sm:$0xff]  ;;  %v131_v22 = vld [vmem:[#allocation6 + $0x1d0] sm:$0xff] }
  0x24   :  { %1019 = vmatprep.subr.mxu1 %v134_v10  ;;  %v117_v16 = vld [vmem:[#allocation6 + $0x160] sm:$0xff]  ;;  %985 = vmatpush3.msra.mxu0 %v86_v11  ;;  %v116_v20 = vld [vmem:[#allocation6 + $0x158] sm:$0xff]  ;;  %v83_v23 = vld [vmem:[#allocation6 + $0x50] sm:$0xff]  ;;  %p1315_p0 = pnand %p1314_p13, %p1308_p10 }
  0x25   :  { %1020 = vmatpush3.msra.mxu1 %v118_v12  ;;  %986 = vmatprep.subr.mxu0 %v101_v13  ;;  %v115_v24 = vld [vmem:[#allocation6 + $0x150] sm:$0xff]  ;;  %v98_v25 = vld [vmem:[#allocation6 + $0xc8] sm:$0xff]  ;;  %v97_v29 = vld [vmem:[#allocation6 + $0xc0] sm:$0xff] }
  0x26   :  { %1021 = vmatprep.subr.mxu1 %v133_v14  ;;  %987 = vmatpush3.msra.mxu0 %v85_v15  ;;  %v130_v26 = vld [vmem:[#allocation6 + $0x1c8] sm:$0xff]  ;;  %v129_v30 = vld [vmem:[#allocation6 + $0x1c0] sm:$0xff]  ;;  %v96_v33 = vld [vmem:[#allocation6 + $0xb8] sm:$0xff] }
  0x27   :  { %1022 = vmatpush3.msra.mxu1 %v117_v16  ;;  %988 = vmatprep.subr.mxu0 %v100_v17  ;;  %v82_v27 = vld [vmem:[#allocation6 + $0x48] sm:$0xff]  ;;  %v81_v31 = vld [vmem:[#allocation6 + $0x40] sm:$0xff]  ;;  %v128_v34 = vld [vmem:[#allocation6 + $0x1b8] sm:$0xff] }
  0x28   :  { %1023 = vmatprep.subr.mxu1 %v132_v18  ;;  %989 = vmatpush3.msra.mxu0 %v84_v19  ;;  %v114_v28 = vld [vmem:[#allocation6 + $0x148] sm:$0xff]  ;;  %v113_v32 = vld [vmem:[#allocation6 + $0x140] sm:$0xff]  ;;  %v80_v35 = vld [vmem:[#allocation6 + $0x38] sm:$0xff] }
  0x29   :  { %1024 = vmatpush3.msra.mxu1 %v116_v20  ;;  %990 = vmatprep.subr.mxu0 %v99_v21  ;;  %v112_v36 = vld [vmem:[#allocation6 + $0x138] sm:$0xff]  ;;  %v95_v37 = vld [vmem:[#allocation6 + $0xb0] sm:$0xff]  ;;  %v94_v41 = vld [vmem:[#allocation6 + $0xa8] sm:$0xff] }
  0x2a   :  { %1025 = vmatprep.subr.mxu1 %v131_v22  ;;  %991 = vmatpush3.msra.mxu0 %v83_v23  ;;  %v127_v38 = vld [vmem:[#allocation6 + $0x1b0] sm:$0xff]  ;;  %v126_v42 = vld [vmem:[#allocation6 + $0x1a8] sm:$0xff]  ;;  %v93_v45 = vld [vmem:[#allocation6 + $0xa0] sm:$0xff] }
  0x2b   :  { %1026 = vmatpush3.msra.mxu1 %v115_v24  ;;  %992 = vmatprep.subr.mxu0 %v98_v25  ;;  %v79_v39 = vld [vmem:[#allocation6 + $0x30] sm:$0xff]  ;;  %v78_v43 = vld [vmem:[#allocation6 + $0x28] sm:$0xff]  ;;  %v125_v46 = vld [vmem:[#allocation6 + $0x1a0] sm:$0xff] }
  0x2c   :  { %1027 = vmatprep.subr.mxu1 %v130_v26  ;;  %993 = vmatpush3.msra.mxu0 %v82_v27  ;;  %v111_v40 = vld [vmem:[#allocation6 + $0x130] sm:$0xff]  ;;  %v110_v44 = vld [vmem:[#allocation6 + $0x128] sm:$0xff]  ;;  %v77_v47 = vld [vmem:[#allocation6 + $0x20] sm:$0xff] }
  0x2d   :  { %1028 = vmatpush3.msra.mxu1 %v114_v28  ;;  %994 = vmatprep.subr.mxu0 %v97_v29  ;;  %v109_v48 = vld [vmem:[#allocation6 + $0x120] sm:$0xff]  ;;  %v92_v49 = vld [vmem:[#allocation6 + $0x98] sm:$0xff]  ;;  %v91_v53 = vld [vmem:[#allocation6 + $0x90] sm:$0xff] }
  0x2e   :  { %1029 = vmatprep.subr.mxu1 %v129_v30  ;;  %995 = vmatpush3.msra.mxu0 %v81_v31  ;;  %v124_v50 = vld [vmem:[#allocation6 + $0x198] sm:$0xff]  ;;  %v123_v54 = vld [vmem:[#allocation6 + $0x190] sm:$0xff]  ;;  %v90_v57 = vld [vmem:[#allocation6 + $0x88] sm:$0xff] }
  0x2f   :  { %1030 = vmatpush3.msra.mxu1 %v113_v32  ;;  %996 = vmatprep.subr.mxu0 %v96_v33  ;;  %v76_v51 = vld [vmem:[#allocation6 + $0x18] sm:$0xff]  ;;  %v75_v55 = vld [vmem:[#allocation6 + $0x10] sm:$0xff]  ;;  %v122_v58 = vld [vmem:[#allocation6 + $0x188] sm:$0xff] }
  0x30   :  { %1031 = vmatprep.subr.mxu1 %v128_v34  ;;  %997 = vmatpush3.msra.mxu0 %v80_v35  ;;  %v108_v52 = vld [vmem:[#allocation6 + $0x118] sm:$0xff]  ;;  %v107_v56 = vld [vmem:[#allocation6 + $0x110] sm:$0xff]  ;;  %v74_v59 = vld [vmem:[#allocation6 + $0x8] sm:$0xff] }
  0x31   :  { %1032 = vmatpush3.msra.mxu1 %v112_v36  ;;  %998 = vmatprep.subr.mxu0 %v95_v37  ;;  %v106_v60 = vld [vmem:[#allocation6 + $0x108] sm:$0xff]  ;;  %v89_v61 = vld [vmem:[#allocation6 + $0x80] sm:$0xff]  ;;  %v60_v3 = vld [vmem:[#allocation3 + $0x18] sm:$0xff] }
  0x32   :  { %1033 = vmatprep.subr.mxu1 %v127_v38  ;;  %999 = vmatpush3.msra.mxu0 %v79_v39  ;;  %v121_v62 = vld [vmem:[#allocation6 + $0x180] sm:$0xff]  ;;  %v58_v0 = vld [vmem:[#allocation3 + $0x8] sm:$0xff]  ;;  %v168_v4 = vld [vmem:[#allocation6 + $0x2f8] sm:$0xff] }
  0x33   :  { %1034 = vmatpush3.msra.mxu1 %v111_v40  ;;  %1000 = vmatprep.subr.mxu0 %v94_v41  ;;  %v73_v63 = vld [vmem:[#allocation6] sm:$0xff]  ;;  %v200_v5 = vld [vmem:[#allocation6 + $0x3f8] sm:$0xff]  ;;  %v59_v6 = vld [vmem:[#allocation3 + $0x10] sm:$0xff] }
  0x34   :  { %1035 = vmatprep.subr.mxu1 %v126_v42  ;;  %1001 = vmatpush3.msra.mxu0 %v78_v43  ;;  %v105_v1 = vld [vmem:[#allocation6 + $0x100] sm:$0xff]  ;;  %v152_v7 = vld [vmem:[#allocation6 + $0x278] sm:$0xff]  ;;  %v167_v9 = vld [vmem:[#allocation6 + $0x2f0] sm:$0xff] }
  0x35   :  { %1036 = vmatpush3.msra.mxu1 %v110_v44  ;;  %1002 = vmatprep.subr.mxu0 %v93_v45  ;;  %v57_v2 = vld [vmem:[#allocation3] sm:$0xff]  ;;  %v184_v8 = vld [vmem:[#allocation6 + $0x378] sm:$0xff]  ;;  %v199_v10 = vld [vmem:[#allocation6 + $0x3f0] sm:$0xff] }
  0x36   :  { %1037 = vmatprep.subr.mxu1 %v125_v46  ;;  %1003 = vmatpush3.msra.mxu0 %v77_v47  ;;  %v151_v11 = vld [vmem:[#allocation6 + $0x270] sm:$0xff]  ;;  %v166_v13 = vld [vmem:[#allocation6 + $0x2e8] sm:$0xff]  ;;  %v165_v17 = vld [vmem:[#allocation6 + $0x2e0] sm:$0xff] }
  0x37   :  { %1038 = vmatpush3.msra.mxu1 %v109_v48  ;;  %1004 = vmatprep.subr.mxu0 %v92_v49  ;;  %v183_v12 = vld [vmem:[#allocation6 + $0x370] sm:$0xff]  ;;  %v198_v14 = vld [vmem:[#allocation6 + $0x3e8] sm:$0xff]  ;;  %v197_v18 = vld [vmem:[#allocation6 + $0x3e0] sm:$0xff] }
  0x38   :  { %1039 = vmatprep.subr.mxu1 %v124_v50  ;;  %1005 = vmatpush3.msra.mxu0 %v76_v51  ;;  %v150_v15 = vld [vmem:[#allocation6 + $0x268] sm:$0xff]  ;;  %v149_v19 = vld [vmem:[#allocation6 + $0x260] sm:$0xff]  ;;  %v164_v21 = vld [vmem:[#allocation6 + $0x2d8] sm:$0xff] }
  0x39   :  { %1040 = vmatpush3.msra.mxu1 %v108_v52  ;;  %1006 = vmatprep.subr.mxu0 %v91_v53  ;;  %v182_v16 = vld [vmem:[#allocation6 + $0x368] sm:$0xff]  ;;  %v181_v20 = vld [vmem:[#allocation6 + $0x360] sm:$0xff]  ;;  %v196_v22 = vld [vmem:[#allocation6 + $0x3d8] sm:$0xff] }
  0x3a   :  { %1041 = vmatprep.subr.mxu1 %v123_v54  ;;  %1007 = vmatpush3.msra.mxu0 %v75_v55  ;;  %v148_v23 = vld [vmem:[#allocation6 + $0x258] sm:$0xff]  ;;  %v163_v25 = vld [vmem:[#allocation6 + $0x2d0] sm:$0xff]  ;;  %v162_v29 = vld [vmem:[#allocation6 + $0x2c8] sm:$0xff] }
  0x3b   :  { %1042 = vmatpush3.msra.mxu1 %v107_v56  ;;  %1008 = vmatprep.subr.mxu0 %v90_v57  ;;  %v180_v24 = vld [vmem:[#allocation6 + $0x358] sm:$0xff]  ;;  %v195_v26 = vld [vmem:[#allocation6 + $0x3d0] sm:$0xff]  ;;  %v194_v30 = vld [vmem:[#allocation6 + $0x3c8] sm:$0xff] }
  0x3c   :  { %1043 = vmatprep.subr.mxu1 %v122_v58  ;;  %1009 = vmatpush3.msra.mxu0 %v74_v59  ;;  %v147_v27 = vld [vmem:[#allocation6 + $0x250] sm:$0xff]  ;;  %v146_v31 = vld [vmem:[#allocation6 + $0x248] sm:$0xff]  ;;  %v161_v33 = vld [vmem:[#allocation6 + $0x2c0] sm:$0xff] }
  0x3d   :  { %1044 = vmatpush3.msra.mxu1 %v106_v60  ;;  %1010 = vmatprep.subr.mxu0 %v89_v61  ;;  %v179_v28 = vld [vmem:[#allocation6 + $0x350] sm:$0xff]  ;;  %v178_v32 = vld [vmem:[#allocation6 + $0x348] sm:$0xff]  ;;  %v193_v34 = vld [vmem:[#allocation6 + $0x3c0] sm:$0xff] }
  0x3e   :  { %1045 = vmatprep.subr.mxu1 %v121_v62  ;;  %1011 = vmatpush3.msra.mxu0 %v73_v63  ;;  %v145_v35 = vld [vmem:[#allocation6 + $0x240] sm:$0xff]  ;;  %v160_v37 = vld [vmem:[#allocation6 + $0x2b8] sm:$0xff]  ;;  %v159_v41 = vld [vmem:[#allocation6 + $0x2b0] sm:$0xff] }
  0x3f   :  { %400 = vmatprep.mubr.f32.mxu0 %v58_v0  ;;  %1046 = vmatpush3.msra.mxu1 %v105_v1  ;;  %v177_v36 = vld [vmem:[#allocation6 + $0x340] sm:$0xff]  ;;  %v192_v38 = vld [vmem:[#allocation6 + $0x3b8] sm:$0xff]  ;;  %v191_v42 = vld [vmem:[#allocation6 + $0x3b0] sm:$0xff] }
  0x40   :  { %401 = vmatmul.mubr.f32.vlgmr.msra.gmra.mxu0 %v57_v2  ;;  %470 = vmatprep.mubr.f32.mxu1 %v60_v3  ;;  %v144_v39 = vld [vmem:[#allocation6 + $0x238] sm:$0xff]  ;;  %v143_v43 = vld [vmem:[#allocation6 + $0x230] sm:$0xff]  ;;  %v158_v45 = vld [vmem:[#allocation6 + $0x2a8] sm:$0xff] }
  0x41   :  { %1050 = vmatprep.subr.mxu0 %v168_v4  ;;  %1085 = vmatprep.subr.mxu1 %v200_v5  ;;  %v176_v40 = vld [vmem:[#allocation6 + $0x338] sm:$0xff]  ;;  %v175_v44 = vld [vmem:[#allocation6 + $0x330] sm:$0xff]  ;;  %v190_v46 = vld [vmem:[#allocation6 + $0x3a8] sm:$0xff] }
  0x42   :  { %471 = vmatmul.mubr.f32.vlgmr.msra.gmra.mxu1 %v59_v6  ;;  %1051 = vmatpush3.msra.mxu0 %v152_v7  ;;  %v142_v47 = vld [vmem:[#allocation6 + $0x228] sm:$0xff]  ;;  %v157_v49 = vld [vmem:[#allocation6 + $0x2a0] sm:$0xff]  ;;  %v156_v53 = vld [vmem:[#allocation6 + $0x298] sm:$0xff] }
  0x43   :  { %1086 = vmatpush3.msra.mxu1 %v184_v8  ;;  %1052 = vmatprep.subr.mxu0 %v167_v9  ;;  %v174_v48 = vld [vmem:[#allocation6 + $0x328] sm:$0xff]  ;;  %v189_v50 = vld [vmem:[#allocation6 + $0x3a0] sm:$0xff]  ;;  %v188_v54 = vld [vmem:[#allocation6 + $0x398] sm:$0xff] }
  0x44   :  { %1087 = vmatprep.subr.mxu1 %v199_v10  ;;  %1053 = vmatpush3.msra.mxu0 %v151_v11  ;;  %v141_v51 = vld [vmem:[#allocation6 + $0x220] sm:$0xff]  ;;  %v140_v55 = vld [vmem:[#allocation6 + $0x218] sm:$0xff]  ;;  %v155_v57 = vld [vmem:[#allocation6 + $0x290] sm:$0xff] }
  0x45   :  { %1088 = vmatpush3.msra.mxu1 %v183_v12  ;;  %1054 = vmatprep.subr.mxu0 %v166_v13  ;;  %v173_v52 = vld [vmem:[#allocation6 + $0x320] sm:$0xff]  ;;  %v172_v56 = vld [vmem:[#allocation6 + $0x318] sm:$0xff]  ;;  %v187_v58 = vld [vmem:[#allocation6 + $0x390] sm:$0xff] }
  0x46   :  { %1089 = vmatprep.subr.mxu1 %v198_v14  ;;  %1055 = vmatpush3.msra.mxu0 %v150_v15  ;;  %v139_v59 = vld [vmem:[#allocation6 + $0x210] sm:$0xff]  ;;  %v154_v61 = vld [vmem:[#allocation6 + $0x288] sm:$0xff]  ;;  %v153_v1 = vld [vmem:[#allocation6 + $0x280] sm:$0xff] }
  0x47   :  { %1090 = vmatpush3.msra.mxu1 %v182_v16  ;;  %1056 = vmatprep.subr.mxu0 %v165_v17  ;;  %v171_v60 = vld [vmem:[#allocation6 + $0x310] sm:$0xff]  ;;  %v186_v62 = vld [vmem:[#allocation6 + $0x388] sm:$0xff]  ;;  %v185_v2 = vld [vmem:[#allocation6 + $0x380] sm:$0xff] }
  0x48   :  { %1091 = vmatprep.subr.mxu1 %v197_v18  ;;  %1057 = vmatpush3.msra.mxu0 %v149_v19  ;;  %v138_v63 = vld [vmem:[#allocation6 + $0x208] sm:$0xff]  ;;  %v137_v3 = vld [vmem:[#allocation6 + $0x200] sm:$0xff]  ;;  %v64_v7 = vld [vmem:[#allocation3 + $0x38] sm:$0xff] }
  0x49   :  { %1092 = vmatpush3.msra.mxu1 %v181_v20  ;;  %1058 = vmatprep.subr.mxu0 %v164_v21  ;;  %v170_v0 = vld [vmem:[#allocation6 + $0x308] sm:$0xff]  ;;  %v169_v5 = vld [vmem:[#allocation6 + $0x300] sm:$0xff]  ;;  %v232_v8 = vld [vmem:[#allocation6 + $0x4f8] sm:$0xff] }
  0x4a   :  { %1093 = vmatprep.subr.mxu1 %v196_v22  ;;  %1059 = vmatpush3.msra.mxu0 %v148_v23  ;;  %v62_v4 = vld [vmem:[#allocation3 + $0x28] sm:$0xff]  ;;  %v61_v6 = vld [vmem:[#allocation3 + $0x20] sm:$0xff]  ;;  %v264_v9 = vld [vmem:[#allocation6 + $0x5f8] sm:$0xff] }
  0x4b   :  { %1094 = vmatpush3.msra.mxu1 %v180_v24  ;;  %1060 = vmatprep.subr.mxu0 %v163_v25  ;;  %v63_v10 = vld [vmem:[#allocation3 + $0x30] sm:$0xff]  ;;  %v216_v11 = vld [vmem:[#allocation6 + $0x478] sm:$0xff]  ;;  %v230_v17 = vld [vmem:[#allocation6 + $0x4e8] sm:$0xff] }
  0x4c   :  { %1095 = vmatprep.subr.mxu1 %v195_v26  ;;  %1061 = vmatpush3.msra.mxu0 %v147_v27  ;;  %v248_v12 = vld [vmem:[#allocation6 + $0x578] sm:$0xff]  ;;  %v231_v13 = vld [vmem:[#allocation6 + $0x4f0] sm:$0xff]  ;;  %v262_v18 = vld [vmem:[#allocation6 + $0x5e8] sm:$0xff] }
  0x4d   :  { %1096 = vmatpush3.msra.mxu1 %v179_v28  ;;  %1062 = vmatprep.subr.mxu0 %v162_v29  ;;  %v263_v14 = vld [vmem:[#allocation6 + $0x5f0] sm:$0xff]  ;;  %v214_v19 = vld [vmem:[#allocation6 + $0x468] sm:$0xff]  ;;  %v229_v21 = vld [vmem:[#allocation6 + $0x4e0] sm:$0xff] }
  0x4e   :  { %1097 = vmatprep.subr.mxu1 %v194_v30  ;;  %1063 = vmatpush3.msra.mxu0 %v146_v31  ;;  %v215_v15 = vld [vmem:[#allocation6 + $0x470] sm:$0xff]  ;;  %v246_v20 = vld [vmem:[#allocation6 + $0x568] sm:$0xff]  ;;  %v261_v22 = vld [vmem:[#allocation6 + $0x5e0] sm:$0xff] }
  0x4f   :  { %1098 = vmatpush3.msra.mxu1 %v178_v32  ;;  %1064 = vmatprep.subr.mxu0 %v161_v33  ;;  %v247_v16 = vld [vmem:[#allocation6 + $0x570] sm:$0xff]  ;;  %v213_v23 = vld [vmem:[#allocation6 + $0x460] sm:$0xff]  ;;  %v228_v25 = vld [vmem:[#allocation6 + $0x4d8] sm:$0xff] }
  0x50   :  { %1099 = vmatprep.subr.mxu1 %v193_v34  ;;  %1065 = vmatpush3.msra.mxu0 %v145_v35  ;;  %v245_v24 = vld [vmem:[#allocation6 + $0x560] sm:$0xff]  ;;  %v260_v26 = vld [vmem:[#allocation6 + $0x5d8] sm:$0xff]  ;;  %v227_v29 = vld [vmem:[#allocation6 + $0x4d0] sm:$0xff] }
  0x51   :  { %1100 = vmatpush3.msra.mxu1 %v177_v36  ;;  %1066 = vmatprep.subr.mxu0 %v160_v37  ;;  %v212_v27 = vld [vmem:[#allocation6 + $0x458] sm:$0xff]  ;;  %v259_v30 = vld [vmem:[#allocation6 + $0x5d0] sm:$0xff]  ;;  %v226_v33 = vld [vmem:[#allocation6 + $0x4c8] sm:$0xff] }
  0x52   :  { %1101 = vmatprep.subr.mxu1 %v192_v38  ;;  %1067 = vmatpush3.msra.mxu0 %v144_v39  ;;  %v244_v28 = vld [vmem:[#allocation6 + $0x558] sm:$0xff]  ;;  %v211_v31 = vld [vmem:[#allocation6 + $0x450] sm:$0xff]  ;;  %v258_v34 = vld [vmem:[#allocation6 + $0x5c8] sm:$0xff] }
  0x53   :  { %1102 = vmatpush3.msra.mxu1 %v176_v40  ;;  %1068 = vmatprep.subr.mxu0 %v159_v41  ;;  %v243_v32 = vld [vmem:[#allocation6 + $0x550] sm:$0xff]  ;;  %v210_v35 = vld [vmem:[#allocation6 + $0x448] sm:$0xff]  ;;  %v225_v37 = vld [vmem:[#allocation6 + $0x4c0] sm:$0xff] }
  0x54   :  { %1103 = vmatprep.subr.mxu1 %v191_v42  ;;  %1069 = vmatpush3.msra.mxu0 %v143_v43  ;;  %v242_v36 = vld [vmem:[#allocation6 + $0x548] sm:$0xff]  ;;  %v257_v38 = vld [vmem:[#allocation6 + $0x5c0] sm:$0xff]  ;;  %v224_v41 = vld [vmem:[#allocation6 + $0x4b8] sm:$0xff] }
  0x55   :  { %1104 = vmatpush3.msra.mxu1 %v175_v44  ;;  %1070 = vmatprep.subr.mxu0 %v158_v45  ;;  %v209_v39 = vld [vmem:[#allocation6 + $0x440] sm:$0xff]  ;;  %v256_v42 = vld [vmem:[#allocation6 + $0x5b8] sm:$0xff]  ;;  %v223_v45 = vld [vmem:[#allocation6 + $0x4b0] sm:$0xff] }
  0x56   :  { %1105 = vmatprep.subr.mxu1 %v190_v46  ;;  %1071 = vmatpush3.msra.mxu0 %v142_v47  ;;  %v241_v40 = vld [vmem:[#allocation6 + $0x540] sm:$0xff]  ;;  %v208_v43 = vld [vmem:[#allocation6 + $0x438] sm:$0xff]  ;;  %v255_v46 = vld [vmem:[#allocation6 + $0x5b0] sm:$0xff] }
  0x57   :  { %1106 = vmatpush3.msra.mxu1 %v174_v48  ;;  %1072 = vmatprep.subr.mxu0 %v157_v49  ;;  %v240_v44 = vld [vmem:[#allocation6 + $0x538] sm:$0xff]  ;;  %v207_v47 = vld [vmem:[#allocation6 + $0x430] sm:$0xff]  ;;  %v222_v49 = vld [vmem:[#allocation6 + $0x4a8] sm:$0xff] }
  0x58   :  { %1107 = vmatprep.subr.mxu1 %v189_v50  ;;  %1073 = vmatpush3.msra.mxu0 %v141_v51  ;;  %v239_v48 = vld [vmem:[#allocation6 + $0x530] sm:$0xff]  ;;  %v254_v50 = vld [vmem:[#allocation6 + $0x5a8] sm:$0xff] }
  0x59   :  { %1108 = vmatpush3.msra.mxu1 %v173_v52  ;;  %1074 = vmatprep.subr.mxu0 %v156_v53  ;;  %v206_v51 = vld [vmem:[#allocation6 + $0x428] sm:$0xff]  ;;  %v221_v53 = vld [vmem:[#allocation6 + $0x4a0] sm:$0xff] }
  0x5a   :  { %1109 = vmatprep.subr.mxu1 %v188_v54  ;;  %1075 = vmatpush3.msra.mxu0 %v140_v55  ;;  %v238_v52 = vld [vmem:[#allocation6 + $0x528] sm:$0xff]  ;;  %v253_v54 = vld [vmem:[#allocation6 + $0x5a0] sm:$0xff] }
  0x5b   :  { %1110 = vmatpush3.msra.mxu1 %v172_v56  ;;  %1076 = vmatprep.subr.mxu0 %v155_v57  ;;  %v205_v55 = vld [vmem:[#allocation6 + $0x420] sm:$0xff]  ;;  %v220_v57 = vld [vmem:[#allocation6 + $0x498] sm:$0xff] }
  0x5c   :  { %1111 = vmatprep.subr.mxu1 %v187_v58  ;;  %1077 = vmatpush3.msra.mxu0 %v139_v59  ;;  %v237_v56 = vld [vmem:[#allocation6 + $0x520] sm:$0xff]  ;;  %v252_v58 = vld [vmem:[#allocation6 + $0x598] sm:$0xff] }
  0x5d   :  { %1112 = vmatpush3.msra.mxu1 %v171_v60  ;;  %1078 = vmatprep.subr.mxu0 %v154_v61  ;;  %v204_v59 = vld [vmem:[#allocation6 + $0x418] sm:$0xff]  ;;  %v219_v61 = vld [vmem:[#allocation6 + $0x490] sm:$0xff] }
  0x5e   :  { %1113 = vmatprep.subr.mxu1 %v186_v62  ;;  %1079 = vmatpush3.msra.mxu0 %v138_v63  ;;  %v236_v60 = vld [vmem:[#allocation6 + $0x518] sm:$0xff]  ;;  %v251_v62 = vld [vmem:[#allocation6 + $0x590] sm:$0xff] }
  0x5f   :  { %1114 = vmatpush3.msra.mxu1 %v170_v0  ;;  %1080 = vmatprep.subr.mxu0 %v153_v1  ;;  %v203_v63 = vld [vmem:[#allocation6 + $0x410] sm:$0xff]  ;;  %v218_v1 = vld [vmem:[#allocation6 + $0x488] sm:$0xff] }
  0x60   :  { %1115 = vmatprep.subr.mxu1 %v185_v2  ;;  %1081 = vmatpush3.msra.mxu0 %v137_v3  ;;  %v235_v0 = vld [vmem:[#allocation6 + $0x510] sm:$0xff]  ;;  %v250_v2 = vld [vmem:[#allocation6 + $0x588] sm:$0xff] }
  0x61   :  { %540 = vmatprep.mubr.f32.mxu0 %v62_v4  ;;  %1116 = vmatpush3.msra.mxu1 %v169_v5  ;;  %v202_v3 = vld [vmem:[#allocation6 + $0x408] sm:$0xff]  ;;  %v217_v5 = vld [vmem:[#allocation6 + $0x480] sm:$0xff] }
  0x62   :  { %541 = vmatmul.mubr.f32.vlgmr.msra.gmra.mxu0 %v61_v6  ;;  %610 = vmatprep.mubr.f32.mxu1 %v64_v7  ;;  %v234_v4 = vld [vmem:[#allocation6 + $0x508] sm:$0xff]  ;;  %v249_v6 = vld [vmem:[#allocation6 + $0x580] sm:$0xff] }
  0x63   :  { %1120 = vmatprep.subr.mxu0 %v232_v8  ;;  %1155 = vmatprep.subr.mxu1 %v264_v9  ;;  %v201_v7 = vld [vmem:[#allocation6 + $0x400] sm:$0xff]  ;;  %v66_v8 = vld [vmem:[#allocation3 + $0x48] sm:$0xff] }
  0x64   :  { %611 = vmatmul.mubr.f32.vlgmr.msra.gmra.mxu1 %v63_v10  ;;  %1121 = vmatpush3.msra.mxu0 %v216_v11  ;;  %v233_v9 = vld [vmem:[#allocation6 + $0x500] sm:$0xff]  ;;  %v68_v11 = vld [vmem:[#allocation3 + $0x58] sm:$0xff] }
  0x65   :  { %1156 = vmatpush3.msra.mxu1 %v248_v12  ;;  %1122 = vmatprep.subr.mxu0 %v231_v13  ;;  %v65_v10 = vld [vmem:[#allocation3 + $0x40] sm:$0xff]  ;;  %v296_v12 = vld [vmem:[#allocation6 + $0x6f8] sm:$0xff] }
  0x66   :  { %1157 = vmatprep.subr.mxu1 %v263_v14  ;;  %1123 = vmatpush3.msra.mxu0 %v215_v15  ;;  %v328_v13 = vld [vmem:[#allocation6 + $0x7f8] sm:$0xff]  ;;  %v67_v14 = vld [vmem:[#allocation3 + $0x50] sm:$0xff] }
  0x67   :  { %1158 = vmatpush3.msra.mxu1 %v247_v16  ;;  %1124 = vmatprep.subr.mxu0 %v230_v17  ;;  %v280_v15 = vld [vmem:[#allocation6 + $0x678] sm:$0xff]  ;;  %v295_v17 = vld [vmem:[#allocation6 + $0x6f0] sm:$0xff] }
  0x68   :  { %1159 = vmatprep.subr.mxu1 %v262_v18  ;;  %1125 = vmatpush3.msra.mxu0 %v214_v19  ;;  %v312_v16 = vld [vmem:[#allocation6 + $0x778] sm:$0xff]  ;;  %v327_v18 = vld [vmem:[#allocation6 + $0x7f0] sm:$0xff] }
  0x69   :  { %1160 = vmatpush3.msra.mxu1 %v246_v20  ;;  %1126 = vmatprep.subr.mxu0 %v229_v21  ;;  %v279_v19 = vld [vmem:[#allocation6 + $0x670] sm:$0xff]  ;;  %v294_v21 = vld [vmem:[#allocation6 + $0x6e8] sm:$0xff] }
  0x6a   :  { %1161 = vmatprep.subr.mxu1 %v261_v22  ;;  %1127 = vmatpush3.msra.mxu0 %v213_v23  ;;  %v311_v20 = vld [vmem:[#allocation6 + $0x770] sm:$0xff]  ;;  %v326_v22 = vld [vmem:[#allocation6 + $0x7e8] sm:$0xff] }
  0x6b   :  { %1162 = vmatpush3.msra.mxu1 %v245_v24  ;;  %1128 = vmatprep.subr.mxu0 %v228_v25  ;;  %v278_v23 = vld [vmem:[#allocation6 + $0x668] sm:$0xff]  ;;  %v293_v25 = vld [vmem:[#allocation6 + $0x6e0] sm:$0xff] }
  0x6c   :  { %1163 = vmatprep.subr.mxu1 %v260_v26  ;;  %1129 = vmatpush3.msra.mxu0 %v212_v27  ;;  %v310_v24 = vld [vmem:[#allocation6 + $0x768] sm:$0xff]  ;;  %v325_v26 = vld [vmem:[#allocation6 + $0x7e0] sm:$0xff] }
  0x6d   :  { %1164 = vmatpush3.msra.mxu1 %v244_v28  ;;  %1130 = vmatprep.subr.mxu0 %v227_v29  ;;  %v277_v27 = vld [vmem:[#allocation6 + $0x660] sm:$0xff]  ;;  %v292_v29 = vld [vmem:[#allocation6 + $0x6d8] sm:$0xff] }
  0x6e   :  { %1165 = vmatprep.subr.mxu1 %v259_v30  ;;  %1131 = vmatpush3.msra.mxu0 %v211_v31  ;;  %v309_v28 = vld [vmem:[#allocation6 + $0x760] sm:$0xff]  ;;  %v324_v30 = vld [vmem:[#allocation6 + $0x7d8] sm:$0xff] }
  0x6f   :  { %1166 = vmatpush3.msra.mxu1 %v243_v32  ;;  %1132 = vmatprep.subr.mxu0 %v226_v33  ;;  %v276_v31 = vld [vmem:[#allocation6 + $0x658] sm:$0xff]  ;;  %v291_v33 = vld [vmem:[#allocation6 + $0x6d0] sm:$0xff] }
  0x70   :  { %1167 = vmatprep.subr.mxu1 %v258_v34  ;;  %1133 = vmatpush3.msra.mxu0 %v210_v35  ;;  %v308_v32 = vld [vmem:[#allocation6 + $0x758] sm:$0xff]  ;;  %v323_v34 = vld [vmem:[#allocation6 + $0x7d0] sm:$0xff] }
  0x71   :  { %1168 = vmatpush3.msra.mxu1 %v242_v36  ;;  %1134 = vmatprep.subr.mxu0 %v225_v37  ;;  %v275_v35 = vld [vmem:[#allocation6 + $0x650] sm:$0xff]  ;;  %v290_v37 = vld [vmem:[#allocation6 + $0x6c8] sm:$0xff] }
  0x72   :  { %1169 = vmatprep.subr.mxu1 %v257_v38  ;;  %1135 = vmatpush3.msra.mxu0 %v209_v39  ;;  %v307_v36 = vld [vmem:[#allocation6 + $0x750] sm:$0xff]  ;;  %v322_v38 = vld [vmem:[#allocation6 + $0x7c8] sm:$0xff] }
  0x73   :  { %1170 = vmatpush3.msra.mxu1 %v241_v40  ;;  %1136 = vmatprep.subr.mxu0 %v224_v41  ;;  %v274_v39 = vld [vmem:[#allocation6 + $0x648] sm:$0xff]  ;;  %v289_v41 = vld [vmem:[#allocation6 + $0x6c0] sm:$0xff] }
  0x74   :  { %1171 = vmatprep.subr.mxu1 %v256_v42  ;;  %1137 = vmatpush3.msra.mxu0 %v208_v43  ;;  %v306_v40 = vld [vmem:[#allocation6 + $0x748] sm:$0xff]  ;;  %v321_v42 = vld [vmem:[#allocation6 + $0x7c0] sm:$0xff] }
  0x75   :  { %1172 = vmatpush3.msra.mxu1 %v240_v44  ;;  %1138 = vmatprep.subr.mxu0 %v223_v45  ;;  %v273_v43 = vld [vmem:[#allocation6 + $0x640] sm:$0xff]  ;;  %v288_v45 = vld [vmem:[#allocation6 + $0x6b8] sm:$0xff] }
  0x76   :  { %1173 = vmatprep.subr.mxu1 %v255_v46  ;;  %1139 = vmatpush3.msra.mxu0 %v207_v47  ;;  %v305_v44 = vld [vmem:[#allocation6 + $0x740] sm:$0xff]  ;;  %v320_v46 = vld [vmem:[#allocation6 + $0x7b8] sm:$0xff] }
  0x77   :  { %1174 = vmatpush3.msra.mxu1 %v239_v48  ;;  %1140 = vmatprep.subr.mxu0 %v222_v49  ;;  %v272_v47 = vld [vmem:[#allocation6 + $0x638] sm:$0xff]  ;;  %v287_v49 = vld [vmem:[#allocation6 + $0x6b0] sm:$0xff] }
  0x78   :  { %1175 = vmatprep.subr.mxu1 %v254_v50  ;;  %1141 = vmatpush3.msra.mxu0 %v206_v51  ;;  %v304_v48 = vld [vmem:[#allocation6 + $0x738] sm:$0xff]  ;;  %v319_v50 = vld [vmem:[#allocation6 + $0x7b0] sm:$0xff] }
  0x79   :  { %1176 = vmatpush3.msra.mxu1 %v238_v52  ;;  %1142 = vmatprep.subr.mxu0 %v221_v53  ;;  %v271_v51 = vld [vmem:[#allocation6 + $0x630] sm:$0xff]  ;;  %v286_v53 = vld [vmem:[#allocation6 + $0x6a8] sm:$0xff] }
  0x7a   :  { %1177 = vmatprep.subr.mxu1 %v253_v54  ;;  %1143 = vmatpush3.msra.mxu0 %v205_v55  ;;  %v303_v52 = vld [vmem:[#allocation6 + $0x730] sm:$0xff]  ;;  %v318_v54 = vld [vmem:[#allocation6 + $0x7a8] sm:$0xff] }
  0x7b   :  { %1178 = vmatpush3.msra.mxu1 %v237_v56  ;;  %1144 = vmatprep.subr.mxu0 %v220_v57  ;;  %v270_v55 = vld [vmem:[#allocation6 + $0x628] sm:$0xff]  ;;  %v285_v57 = vld [vmem:[#allocation6 + $0x6a0] sm:$0xff] }
  0x7c   :  { %1179 = vmatprep.subr.mxu1 %v252_v58  ;;  %1145 = vmatpush3.msra.mxu0 %v204_v59  ;;  %v302_v56 = vld [vmem:[#allocation6 + $0x728] sm:$0xff]  ;;  %v317_v58 = vld [vmem:[#allocation6 + $0x7a0] sm:$0xff] }
  0x7d   :  { %1180 = vmatpush3.msra.mxu1 %v236_v60  ;;  %1146 = vmatprep.subr.mxu0 %v219_v61  ;;  %v269_v59 = vld [vmem:[#allocation6 + $0x620] sm:$0xff]  ;;  %v284_v61 = vld [vmem:[#allocation6 + $0x698] sm:$0xff] }
  0x7e   :  { %1181 = vmatprep.subr.mxu1 %v251_v62  ;;  %1147 = vmatpush3.msra.mxu0 %v203_v63  ;;  %v301_v60 = vld [vmem:[#allocation6 + $0x720] sm:$0xff]  ;;  %v316_v62 = vld [vmem:[#allocation6 + $0x798] sm:$0xff] }
  0x7f   :  { %1182 = vmatpush3.msra.mxu1 %v235_v0  ;;  %1148 = vmatprep.subr.mxu0 %v218_v1  ;;  %v268_v63 = vld [vmem:[#allocation6 + $0x618] sm:$0xff]  ;;  %v283_v1 = vld [vmem:[#allocation6 + $0x690] sm:$0xff] }
  0x80   :  { %1183 = vmatprep.subr.mxu1 %v250_v2  ;;  %1149 = vmatpush3.msra.mxu0 %v202_v3  ;;  %v300_v0 = vld [vmem:[#allocation6 + $0x718] sm:$0xff]  ;;  %v315_v2 = vld [vmem:[#allocation6 + $0x790] sm:$0xff] }
  0x81   :  { %1184 = vmatpush3.msra.mxu1 %v234_v4  ;;  %1150 = vmatprep.subr.mxu0 %v217_v5  ;;  %v267_v3 = vld [vmem:[#allocation6 + $0x610] sm:$0xff]  ;;  %v282_v5 = vld [vmem:[#allocation6 + $0x688] sm:$0xff] }
  0x82   :  { %1185 = vmatprep.subr.mxu1 %v249_v6  ;;  %1151 = vmatpush3.msra.mxu0 %v201_v7  ;;  %v299_v4 = vld [vmem:[#allocation6 + $0x710] sm:$0xff]  ;;  %v314_v6 = vld [vmem:[#allocation6 + $0x788] sm:$0xff] }
  0x83   :  { %680 = vmatprep.mubr.f32.mxu0 %v66_v8  ;;  %1186 = vmatpush3.msra.mxu1 %v233_v9  ;;  %v266_v7 = vld [vmem:[#allocation6 + $0x608] sm:$0xff]  ;;  %v281_v9 = vld [vmem:[#allocation6 + $0x680] sm:$0xff] }
  0x84   :  { %681 = vmatmul.mubr.f32.vlgmr.msra.gmra.mxu0 %v65_v10  ;;  %750 = vmatprep.mubr.f32.mxu1 %v68_v11  ;;  %v298_v8 = vld [vmem:[#allocation6 + $0x708] sm:$0xff]  ;;  %v313_v10 = vld [vmem:[#allocation6 + $0x780] sm:$0xff] }
  0x85   :  { %1190 = vmatprep.subr.mxu0 %v296_v12  ;;  %1225 = vmatprep.subr.mxu1 %v328_v13  ;;  %v265_v11 = vld [vmem:[#allocation6 + $0x600] sm:$0xff]  ;;  %v70_v12 = vld [vmem:[#allocation3 + $0x68] sm:$0xff] }
  0x86   :  { %751 = vmatmul.mubr.f32.vlgmr.msra.gmra.mxu1 %v67_v14  ;;  %1191 = vmatpush3.msra.mxu0 %v280_v15  ;;  %v297_v13 = vld [vmem:[#allocation6 + $0x700] sm:$0xff]  ;;  %v72_v14 = vld [vmem:[#allocation3 + $0x78] sm:$0xff] }
  0x87   :  { %1226 = vmatpush3.msra.mxu1 %v312_v16  ;;  %1192 = vmatprep.subr.mxu0 %v295_v17  ;;  %v69_v15 = vld [vmem:[#allocation3 + $0x60] sm:$0xff]  ;;  %v71_v16 = vld [vmem:[#allocation3 + $0x70] sm:$0xff] }
  0x88   :  { %1227 = vmatprep.subr.mxu1 %v327_v18  ;;  %1193 = vmatpush3.msra.mxu0 %v279_v19 }
  0x89   :  { %1228 = vmatpush3.msra.mxu1 %v311_v20  ;;  %1194 = vmatprep.subr.mxu0 %v294_v21 }
  0x8a   :  { %1229 = vmatprep.subr.mxu1 %v326_v22  ;;  %1195 = vmatpush3.msra.mxu0 %v278_v23  ;;  %v975_v22 = vld [vmem:[%s1412_s2] ss:$0 sm:$0xff] }
  0x8b   :  { %1230 = vmatpush3.msra.mxu1 %v310_v24  ;;  %1196 = vmatprep.subr.mxu0 %v293_v25 }
  0x8c   :  { %1231 = vmatprep.subr.mxu1 %v325_v26  ;;  %1197 = vmatpush3.msra.mxu0 %v277_v27 }
  0x8d   :  { %1232 = vmatpush3.msra.mxu1 %v309_v28  ;;  %1198 = vmatprep.subr.mxu0 %v292_v29 }
  0x8e   :  { %1233 = vmatprep.subr.mxu1 %v324_v30  ;;  %1199 = vmatpush3.msra.mxu0 %v276_v31 }
  0x8f   :  { %1234 = vmatpush3.msra.mxu1 %v308_v32  ;;  %1200 = vmatprep.subr.mxu0 %v291_v33 }
  0x90   :  { %1235 = vmatprep.subr.mxu1 %v323_v34  ;;  %1201 = vmatpush3.msra.mxu0 %v275_v35 }
  0x91   :  { %1236 = vmatpush3.msra.mxu1 %v307_v36  ;;  %1202 = vmatprep.subr.mxu0 %v290_v37 }
  0x92   :  { %1237 = vmatprep.subr.mxu1 %v322_v38  ;;  %1203 = vmatpush3.msra.mxu0 %v274_v39 }
  0x93   :  { %1238 = vmatpush3.msra.mxu1 %v306_v40  ;;  %1204 = vmatprep.subr.mxu0 %v289_v41 }
  0x94   :  { %1239 = vmatprep.subr.mxu1 %v321_v42  ;;  %1205 = vmatpush3.msra.mxu0 %v273_v43 }
  0x95   :  { %1240 = vmatpush3.msra.mxu1 %v305_v44  ;;  %1206 = vmatprep.subr.mxu0 %v288_v45 }
  0x96   :  { %1241 = vmatprep.subr.mxu1 %v320_v46  ;;  %1207 = vmatpush3.msra.mxu0 %v272_v47 }
  0x97   :  { %1242 = vmatpush3.msra.mxu1 %v304_v48  ;;  %1208 = vmatprep.subr.mxu0 %v287_v49 }
  0x98   :  { %1243 = vmatprep.subr.mxu1 %v319_v50  ;;  %1209 = vmatpush3.msra.mxu0 %v271_v51 }
  0x99   :  { %1244 = vmatpush3.msra.mxu1 %v303_v52  ;;  %1210 = vmatprep.subr.mxu0 %v286_v53 }
  0x9a   :  { %1245 = vmatprep.subr.mxu1 %v318_v54  ;;  %1211 = vmatpush3.msra.mxu0 %v270_v55 }
  0x9b   :  { %1246 = vmatpush3.msra.mxu1 %v302_v56  ;;  %1212 = vmatprep.subr.mxu0 %v285_v57 }
  0x9c   :  { %1247 = vmatprep.subr.mxu1 %v317_v58  ;;  %1213 = vmatpush3.msra.mxu0 %v269_v59 }
  0x9d   :  { %1248 = vmatpush3.msra.mxu1 %v301_v60  ;;  %1214 = vmatprep.subr.mxu0 %v284_v61 }
  0x9e   :  { %1249 = vmatprep.subr.mxu1 %v316_v62  ;;  %1215 = vmatpush3.msra.mxu0 %v268_v63 }
  0x9f   :  { %1250 = vmatpush3.msra.mxu1 %v300_v0  ;;  %1216 = vmatprep.subr.mxu0 %v283_v1 }
  0xa0   :  { %1251 = vmatprep.subr.mxu1 %v315_v2  ;;  %1217 = vmatpush3.msra.mxu0 %v267_v3 }
  0xa1   :  { %1252 = vmatpush3.msra.mxu1 %v299_v4  ;;  %1218 = vmatprep.subr.mxu0 %v282_v5  ;;  %v976_v5 = vld [vmem:[%s1413_s3] ss:$0 sm:$0xff] }
  0xa2   :  { %1253 = vmatprep.subr.mxu1 %v314_v6  ;;  %1219 = vmatpush3.msra.mxu0 %v266_v7  ;;  %v977_v7 = vld [vmem:[%s1414_s4] ss:$0 sm:$0xff] }
  0xa3   :  { %1254 = vmatpush3.msra.mxu1 %v298_v8  ;;  %1220 = vmatprep.subr.mxu0 %v281_v9  ;;  %v978_v9 = vld [vmem:[%s1415_s5] ss:$0 sm:$0xff] }
  0xa4   :  { %1255 = vmatprep.subr.mxu1 %v313_v10  ;;  %1221 = vmatpush3.msra.mxu0 %v265_v11 }
  0xa5   :  { %820 = vmatprep.mubr.f32.mxu0 %v70_v12  ;;  %1256 = vmatpush3.msra.mxu1 %v297_v13 }
  0xa6   :  { %890 = vmatprep.mubr.f32.mxu1 %v72_v14  ;;  %821 = vmatmul.mubr.f32.vlgmr.msra.gmra.mxu0 %v69_v15 }
  0xa7   :  { %891 = vmatmul.mubr.f32.vlgmr.msra.gmra.mxu1 %v71_v16 }
 0x100   :  { %v1012_v17 = vpop.f32.mrf.mxu0 }
 0x102   :  { %v1047_v18 = vpop.f32.mrf.mxu1  ;;  %v1013_v19 = vpop.f32.mrf.mxu0 }
 0x103   :  { %v1014_v21 = vadd.f32 %v1013_v19, %v1012_v17 }
 0x104   :  { %v1048_v23 = vpop.f32.mrf.mxu1 }
 0x105   :  { %v403_v26 = vadd.f32 %v1014_v21, %v975_v22  ;;  %v1049_v27 = vadd.f32 %v1048_v23, %v1047_v18 }
 0x107   :  { %v473_v31 = vadd.f32 %v1049_v27, %v403_v26 }
 0x122   :  { %v1082_v20 = vpop.f32.mrf.mxu0 }
 0x124   :  { %v1117_v24 = vpop.f32.mrf.mxu1  ;;  %v1083_v25 = vpop.f32.mrf.mxu0 }
 0x125   :  { %v1084_v29 = vadd.f32 %v1083_v25, %v1082_v20 }
 0x126   :  { %v1118_v30 = vpop.f32.mrf.mxu1 }
 0x127   :  { %v543_v34 = vadd.f32 %v1084_v29, %v473_v31  ;;  %v1119_v35 = vadd.f32 %v1118_v30, %v1117_v24 }
 0x129   :  { %v613_v38 = vadd.f32 %v1119_v35, %v543_v34 }
 0x144   :  { %v1152_v28 = vpop.f32.mrf.mxu0 }
 0x146   :  { %v1187_v32 = vpop.f32.mrf.mxu1  ;;  %v1153_v33 = vpop.f32.mrf.mxu0 }
 0x147   :  { %v1154_v36 = vadd.f32 %v1153_v33, %v1152_v28 }
 0x148   :  { %v1188_v37 = vpop.f32.mrf.mxu1 }
 0x149   :  { %v683_v39 = vadd.f32 %v1154_v36, %v613_v38  ;;  %v1189_v40 = vadd.f32 %v1188_v37, %v1187_v32 }
 0x14b   :  { %v753_v45 = vadd.f32 %v1189_v40, %v683_v39 }
 0x166   :  { %v1222_v41 = vpop.f32.mrf.mxu0 }
 0x167   :  { %v1257_v42 = vpop.f32.mrf.mxu1 }
 0x168   :  { %v1223_v43 = vpop.f32.mrf.mxu0 }
 0x169   :  { %v1258_v44 = vpop.f32.mrf.mxu1  ;;  %v1224_v46 = vadd.f32 %v1223_v43, %v1222_v41 }
 0x16a   :  { %v1259_v48 = vadd.f32 %v1258_v44, %v1257_v42 }
 0x16b   :  { %v823_v47 = vadd.f32 %v1224_v46, %v753_v45 }
 0x16d   :  { %v893_v49 = vadd.f32 %v1259_v48, %v823_v47 }
 0x16f   :  { %v898_v50 = vmax.f32 %v893_v49, 0.0  ;;  %897 = vst.msk [vmem:[#allocation8] sm:$0xff] %vm896_vm0, %v893_v49 }
 0x171   :  { %v899_v51 = vrot.slane %v898_v50, 4 }
 0x173   :  { %v900_v52 = vadd.f32 %v899_v51, %v898_v50 }
 0x175   :  { %v901_v53 = vrot.slane %v900_v52, 2 }
 0x177   :  { %v902_v54 = vadd.f32 %v901_v53, %v900_v52 }
 0x179   :  { %v903_v55 = vrot.slane %v902_v54, 1 }
 0x17b   :  { %v904_v56 = vadd.f32 %v903_v55, %v902_v54 }
 0x17d   :  { %v906_v57 = vmul.f32 0.125, %v904_v56 }
 0x17f   :  { %v907_v58 = vsub.f32 %v898_v50, %v906_v57 }
 0x181   :  { %v908_v59 = vmul.f32 %v907_v58, %v907_v58 }
 0x183   :  { %v909_v60 = vrot.slane %v908_v59, 4 }
 0x185   :  { %v910_v61 = vadd.f32 %v909_v60, %v908_v59 }
 0x187   :  { %v911_v62 = vrot.slane %v910_v61, 2 }
 0x189   :  { %v912_v63 = vadd.f32 %v911_v62, %v910_v61 }
 0x18b   :  { %v913_v0 = vrot.slane %v912_v63, 1 }
 0x18d   :  { %v914_v1 = vadd.f32 %v913_v0, %v912_v63 }
 0x18f   :  { %v915_v2 = vmul.f32 0.125, %v914_v1 }
 0x191   :  { %v916_v3 = vadd.f32 1e-05, %v915_v2 }
 0x193   :  { %1265 = vrsqrt.f32 %v916_v3 }
 0x1a0   :  { %v1266_v4 = vpop.eup %1265 }
 0x1a1   :  { %v918_v6 = vmul.f32 %v1266_v4, %v907_v58 }
 0x1a3   :  { %v926_v8 = vmul.f32 %v976_v5, %v918_v6 }
 0x1a5   :  { %v934_v10 = vadd.f32 %v977_v7, %v926_v8 }
 0x1a7   :  { %v942_v11 = vmul.f32 %v978_v9, %v934_v10 }
 0x1a9   :  { %943 = vadd.xlane.f32.xlu0 %v942_v11 }
 0x1aa   :  { %1318 = shalt.err (!%p1315_p0)
}
 0x1ab   :  { %964 = dma.vmem_to_hbm [thread:$0]  %s962_s24, 128, %s1417_s7, [#allocation5]   ;;  %v979_v12 = vld [vmem:[#allocation2] ss:$0 sm:$0xff]  ;;  %vm953_vm1 = vcmask 7168  }
 0x232   :  { %v944_v13 = vpop.xlane.xlu0 %943 }
 0x233   :  { %v952_v14 = vadd.f32 %v979_v12, %v944_v13 }
 0x235   :  { %954 = vst.msk [vmem:[%s1418_s8] sm:$0xff] %vm953_vm1, %v952_v14 }
 0x236   :  { %1331 = dma.done.wait [#allocation5], 128  }
 0x237   :  { %1332 = vsyncadd [#allocation5], 4294967168 }
 0x238   :  { %972 = vsyncpa [#allocation4], 1 }
 0x239   :  { %973 = vsyncpa [#allocation7], 1 }
 0x23a   :  { %974 = vsyncpa [#allocation5], 1 }

</bundles_post_ra>
